<compile_context>
chip_gen: v5e
topology: v5e:2x2
jax: 0.10.0
libtpu: 0.0.40
codegen_flags: <defaults>
</compile_context>

<pallas_src>
import jax
import jax.numpy as jnp
from jax.experimental import pallas as pl
from jax.experimental.pallas import tpu as pltpu

# Logical sizes implied by the module: y_obs.shape[1] + 2 = 30 + 2 = 32 inputs.
IN_DIM = 32
H0 = 50
H1 = 20
OUT_DIM = 2

# Lane/sublane-friendly padded sizes used inside the kernel (VMEM-resident weights only).
H0_PAD = 64       # 50 -> 64
H1_PAD = 32       # 20 -> 32
OUT_PAD_MXU = 128 # W2 compute width on the MXU; only the first 2 columns are stored

TM_MAX = 4096     # batch tile (rows)
TM_SPLIT_MIN = 256  # split a big single-tile grid in two only if each half has >= this many rows


def _round_up(x, m):
    return ((x + m - 1) // m) * m


def _pad2d(a, rows, cols):
    return jnp.pad(a, ((0, rows - a.shape[0]), (0, cols - a.shape[1])))


def _tile_rows(batch):
    """Rows per grid step: as large as possible, but >= 2 tiles for big batches (v7x 2 TCs)."""
    b8 = _round_up(max(batch, 8), 8)
    tm = min(TM_MAX, b8)
    if tm == b8 and b8 >= 2 * TM_SPLIT_MIN:
        tm = _round_up(pl.cdiv(b8, 2), 8)
    return tm


def mlp_kernel(x_ref, w0_ref, b0_ref, w1_ref, b1_ref, w2_ref, b2_ref, o_ref):
    # X is read as f32 from HBM; cast to bf16 on the VPU (free) for the MXU.
    x = x_ref[...].astype(jnp.bfloat16)

    # dense0 + relu (bf16 operands on the MXU, f32 accumulation; f32 VPU epilogue -> v5e-safe)
    h0 = jnp.dot(x, w0_ref[...], preferred_element_type=jnp.float32)
    h0 = jnp.maximum(h0 + b0_ref[...], 0.0)

    # dropout(p=0.5): identity in eval / inference mode.

    # dense1 + relu
    h1 = jnp.dot(h0.astype(jnp.bfloat16), w1_ref[...], preferred_element_type=jnp.float32)
    h1 = jnp.maximum(h1 + b1_ref[...], 0.0)

    # output layer: MXU matmul on a 128-lane padded W2, then bias+sigmoid+store on
    # only the 2 real columns (slim HBM writeback).
    logits = jnp.dot(h1.astype(jnp.bfloat16), w2_ref[...], preferred_element_type=jnp.float32)
    o_ref[...] = jax.nn.sigmoid(logits[:, :OUT_DIM] + b2_ref[...]).astype(o_ref.dtype)


def prepare_params(w0, b0, w1, b1, w2, b2):
    """One-time pad + cast of the weights (keep out of the per-call hot path)."""
    return (
        _pad2d(w0, IN_DIM, H0_PAD).astype(jnp.bfloat16),
        _pad2d(b0, 1, H0_PAD).astype(jnp.float32),
        _pad2d(w1, H0_PAD, H1_PAD).astype(jnp.bfloat16),
        _pad2d(b1, 1, H1_PAD).astype(jnp.float32),
        _pad2d(w2, H1_PAD, OUT_PAD_MXU).astype(jnp.bfloat16),
        b2.reshape(1, OUT_DIM).astype(jnp.float32),
    )


@jax.jit
def classifier_forward(x, params):
    """x: [B, 32] f32; params: output of prepare_params. Returns [B, 2] f32 probabilities."""
    w0p, b0p, w1p, b1p, w2p, b2p = params
    B = x.shape[0]

    tm = _tile_rows(B)
    grid_b = pl.cdiv(B, tm)
    b_pad = grid_b * tm
    if b_pad != B:
        x = jnp.pad(x, ((0, b_pad - B), (0, 0)))

    flops = 2 * b_pad * (IN_DIM * H0_PAD + H0_PAD * H1_PAD + H1_PAD * OUT_PAD_MXU)
    bytes_accessed = (
        b_pad * IN_DIM * 4                                                    # X (f32)
        + b_pad * OUT_DIM * 4                                                 # output (f32, 2 cols)
        + (IN_DIM * H0_PAD + H0_PAD * H1_PAD + H1_PAD * OUT_PAD_MXU) * 2      # weights (bf16)
        + (H0_PAD + H1_PAD + OUT_DIM) * 4                                     # biases (f32)
    )

    out = pl.pallas_call(
        mlp_kernel,
        out_shape=jax.ShapeDtypeStruct((b_pad, OUT_DIM), jnp.float32),
        grid=(grid_b,),
        in_specs=[
            pl.BlockSpec((tm, IN_DIM), lambda i: (i, 0)),            # X tile (streamed, f32)
            pl.BlockSpec((IN_DIM, H0_PAD), lambda i: (0, 0)),        # W0 (resident)
            pl.BlockSpec((1, H0_PAD), lambda i: (0, 0)),             # b0
            pl.BlockSpec((H0_PAD, H1_PAD), lambda i: (0, 0)),        # W1
            pl.BlockSpec((1, H1_PAD), lambda i: (0, 0)),             # b1
            pl.BlockSpec((H1_PAD, OUT_PAD_MXU), lambda i: (0, 0)),   # W2 (padded for MXU)
            pl.BlockSpec((1, OUT_DIM), lambda i: (0, 0)),            # b2 (2 real cols)
        ],
        out_specs=pl.BlockSpec((tm, OUT_DIM), lambda i: (i, 0)),     # slim (tm, 2) writeback
        compiler_params=pltpu.CompilerParams(
            dimension_semantics=("parallel",),
            vmem_limit_bytes=32 * 1024 * 1024,
        ),
        cost_estimate=pl.CostEstimate(
            flops=flops,
            transcendentals=2 * b_pad * OUT_DIM,   # sigmoid = exp + recip on 2 cols/row
            bytes_accessed=bytes_accessed,
        ),
    )(x, w0p, b0p, w1p, b1p, w2p, b2p)

    # Strip batch padding only (output already has exactly OUT_DIM columns).
    return out[:B, :]


def init_params(key):
    # Deterministic init mimicking PyTorch nn.Linear default (uniform +/- 1/sqrt(fan_in)).
    def linear(key, fan_in, fan_out):
        kw, kb = jax.random.split(key)
        bound = 1.0 / jnp.sqrt(fan_in)
        # stored as [in, out] (pre-transposed vs torch's [out, in])
        w = jax.random.uniform(kw, (fan_in, fan_out), jnp.float32, -bound, bound)
        b = jax.random.uniform(kb, (1, fan_out), jnp.float32, -bound, bound)
        return w, b

    k0, k1, k2 = jax.random.split(key, 3)
    w0, b0 = linear(k0, IN_DIM, H0)
    w1, b1 = linear(k1, H0, H1)
    w2, b2 = linear(k2, H1, OUT_DIM)
    return w0, b0, w1, b1, w2, b2


if __name__ == "__main__":
    key = jax.random.PRNGKey(0)
    kx, kp = jax.random.split(key)

    B = 10  # small batch (also exercises the pad-to-tile / slice-back path)
    x = jax.random.normal(kx, (B, IN_DIM), jnp.float32)
    w0, b0, w1, b1, w2, b2 = init_params(kp)

    params = prepare_params(w0, b0, w1, b1, w2, b2)   # one-time pad/cast
    out = classifier_forward(x, params)
    out = jax.block_until_ready(out)

    # Reference check in plain f32 JAX (kernel uses bf16 matmul operands -> loose tol).
    h0 = jnp.maximum(x @ w0 + b0, 0.0)
    h1 = jnp.maximum(h0 @ w1 + b1, 0.0)
    ref = jax.nn.sigmoid(h1 @ w2 + b2)
    assert out.shape == (B, OUT_DIM)
    assert jnp.allclose(out, ref, atol=5e-2), "mismatch vs reference"

    print("KERNEL_OK")
</pallas_src>

<mosaic_0001>
module attributes {stable_mosaic.version = 11 : i64} {
  func.func @mlp_kernel(%arg0: i32, %arg1: memref<16x32xf32, #tpu.memory_space<vmem>>, %arg2: memref<32x64xbf16, #tpu.memory_space<vmem>>, %arg3: memref<1x64xf32, #tpu.memory_space<vmem>>, %arg4: memref<64x32xbf16, #tpu.memory_space<vmem>>, %arg5: memref<1x32xf32, #tpu.memory_space<vmem>>, %arg6: memref<32x128xbf16, #tpu.memory_space<vmem>>, %arg7: memref<1x2xf32, #tpu.memory_space<vmem>>, %arg8: memref<16x2xf32, #tpu.memory_space<vmem>>) attributes {dimension_semantics = [#tpu.dimension_semantics<parallel>], iteration_bounds = array<i64: 1>, scalar_prefetch = 0 : i64, scratch_operands = 0 : i64, tpu.core_type = #tpu.core_type<tc>, window_params = [{transform_indices = @transform_0, window_bounds = array<i64: 16, 32>}, {pipeline_mode = #tpu.pipeline_mode<synchronous>, transform_indices = @transform_1, window_bounds = array<i64: 32, 64>}, {pipeline_mode = #tpu.pipeline_mode<synchronous>, transform_indices = @transform_2, window_bounds = array<i64: 1, 64>}, {pipeline_mode = #tpu.pipeline_mode<synchronous>, transform_indices = @transform_3, window_bounds = array<i64: 64, 32>}, {pipeline_mode = #tpu.pipeline_mode<synchronous>, transform_indices = @transform_4, window_bounds = array<i64: 1, 32>}, {pipeline_mode = #tpu.pipeline_mode<synchronous>, transform_indices = @transform_5, window_bounds = array<i64: 32, 128>}, {pipeline_mode = #tpu.pipeline_mode<synchronous>, transform_indices = @transform_6, window_bounds = array<i64: 1, 2>}, {transform_indices = @transform_7, window_bounds = array<i64: 16, 2>}]} {
    %c0 = arith.constant 0 : index
    %c0_0 = arith.constant 0 : index
    %0 = vector.load %arg1[%c0, %c0_0] : memref<16x32xf32, #tpu.memory_space<vmem>>, vector<16x32xf32>
    %1 = arith.truncf %0 : vector<16x32xf32> to vector<16x32xbf16>
    %c0_1 = arith.constant 0 : index
    %c0_2 = arith.constant 0 : index
    %2 = vector.load %arg2[%c0_1, %c0_2] : memref<32x64xbf16, #tpu.memory_space<vmem>>, vector<32x64xbf16>
    %cst = arith.constant dense<0.000000e+00> : vector<16x64xf32>
    %3 = tpu.matmul %1, %2, %cst {dimension_numbers = #tpu.dot_dimension_numbers<[1], [0], [0], [1], [0, 0, 1, 1], [], []>} : vector<16x32xbf16>, vector<32x64xbf16>, vector<16x64xf32> -> vector<16x64xf32>
    %c0_3 = arith.constant 0 : index
    %c0_4 = arith.constant 0 : index
    %4 = vector.load %arg3[%c0_3, %c0_4] : memref<1x64xf32, #tpu.memory_space<vmem>>, vector<1x64xf32>
    %5 = vector.broadcast %4 : vector<1x64xf32> to vector<16x64xf32>
    %6 = arith.addf %3, %5 : vector<16x64xf32>
    %cst_5 = arith.constant 0.000000e+00 : f32
    %7 = vector.broadcast %cst_5 : f32 to vector<16x64xf32>
    %8 = arith.maximumf %6, %7 : vector<16x64xf32>
    %9 = arith.truncf %8 : vector<16x64xf32> to vector<16x64xbf16>
    %c0_6 = arith.constant 0 : index
    %c0_7 = arith.constant 0 : index
    %10 = vector.load %arg4[%c0_6, %c0_7] : memref<64x32xbf16, #tpu.memory_space<vmem>>, vector<64x32xbf16>
    %cst_8 = arith.constant dense<0.000000e+00> : vector<16x32xf32>
    %11 = tpu.matmul %9, %10, %cst_8 {dimension_numbers = #tpu.dot_dimension_numbers<[1], [0], [0], [1], [0, 0, 1, 1], [], []>} : vector<16x64xbf16>, vector<64x32xbf16>, vector<16x32xf32> -> vector<16x32xf32>
    %c0_9 = arith.constant 0 : index
    %c0_10 = arith.constant 0 : index
    %12 = vector.load %arg5[%c0_9, %c0_10] : memref<1x32xf32, #tpu.memory_space<vmem>>, vector<1x32xf32>
    %13 = vector.broadcast %12 : vector<1x32xf32> to vector<16x32xf32>
    %14 = arith.addf %11, %13 : vector<16x32xf32>
    %cst_11 = arith.constant 0.000000e+00 : f32
    %15 = vector.broadcast %cst_11 : f32 to vector<16x32xf32>
    %16 = arith.maximumf %14, %15 : vector<16x32xf32>
    %17 = arith.truncf %16 : vector<16x32xf32> to vector<16x32xbf16>
    %c0_12 = arith.constant 0 : index
    %c0_13 = arith.constant 0 : index
    %18 = vector.load %arg6[%c0_12, %c0_13] : memref<32x128xbf16, #tpu.memory_space<vmem>>, vector<32x128xbf16>
    %cst_14 = arith.constant dense<0.000000e+00> : vector<16x128xf32>
    %19 = tpu.matmul %17, %18, %cst_14 {dimension_numbers = #tpu.dot_dimension_numbers<[1], [0], [0], [1], [0, 0, 1, 1], [], []>} : vector<16x32xbf16>, vector<32x128xbf16>, vector<16x128xf32> -> vector<16x128xf32>
    %20 = vector.extract_strided_slice %19 {offsets = [0, 0], sizes = [16, 2], strides = [1, 1]} : vector<16x128xf32> to vector<16x2xf32>
    %c0_15 = arith.constant 0 : index
    %c0_16 = arith.constant 0 : index
    %21 = vector.load %arg7[%c0_15, %c0_16] : memref<1x2xf32, #tpu.memory_space<vmem>>, vector<1x2xf32>
    %22 = vector.broadcast %21 : vector<1x2xf32> to vector<16x2xf32>
    %23 = arith.addf %20, %22 : vector<16x2xf32>
    %24 = arith.negf %23 : vector<16x2xf32>
    %25 = math.exp %24 : vector<16x2xf32>
    %cst_17 = arith.constant 1.000000e+00 : f32
    %26 = vector.broadcast %cst_17 : f32 to vector<16x2xf32>
    %27 = arith.addf %26, %25 : vector<16x2xf32>
    %28 = arith.divf %26, %27 : vector<16x2xf32>
    %c0_18 = arith.constant 0 : index
    %c0_19 = arith.constant 0 : index
    %29 = vector.load %arg8[%c0_18, %c0_19] : memref<16x2xf32, #tpu.memory_space<vmem>>, vector<16x2xf32>
    tpu.vector_store %arg8[%c0_18, %c0_19], %28 {strides = array<i32>} : memref<16x2xf32, #tpu.memory_space<vmem>>, vector<16x2xf32>,
    return
  }
  func.func @transform_0(%arg0: i32) -> (i32, i32) {
    %c0_i32 = arith.constant 0 : i32
    %c0_i32_0 = arith.constant 0 : i32
    return %arg0, %c0_i32 : i32, i32
  }
  func.func @transform_1(%arg0: i32) -> (i32, i32) {
    %c0_i32 = arith.constant 0 : i32
    %c0_i32_0 = arith.constant 0 : i32
    %c0_i32_1 = arith.constant 0 : i32
    return %c0_i32, %c0_i32_0 : i32, i32
  }
  func.func @transform_2(%arg0: i32) -> (i32, i32) {
    %c0_i32 = arith.constant 0 : i32
    %c0_i32_0 = arith.constant 0 : i32
    %c0_i32_1 = arith.constant 0 : i32
    return %c0_i32, %c0_i32_0 : i32, i32
  }
  func.func @transform_3(%arg0: i32) -> (i32, i32) {
    %c0_i32 = arith.constant 0 : i32
    %c0_i32_0 = arith.constant 0 : i32
    %c0_i32_1 = arith.constant 0 : i32
    return %c0_i32, %c0_i32_0 : i32, i32
  }
  func.func @transform_4(%arg0: i32) -> (i32, i32) {
    %c0_i32 = arith.constant 0 : i32
    %c0_i32_0 = arith.constant 0 : i32
    %c0_i32_1 = arith.constant 0 : i32
    return %c0_i32, %c0_i32_0 : i32, i32
  }
  func.func @transform_5(%arg0: i32) -> (i32, i32) {
    %c0_i32 = arith.constant 0 : i32
    %c0_i32_0 = arith.constant 0 : i32
    %c0_i32_1 = arith.constant 0 : i32
    return %c0_i32, %c0_i32_0 : i32, i32
  }
  func.func @transform_6(%arg0: i32) -> (i32, i32) {
    %c0_i32 = arith.constant 0 : i32
    %c0_i32_0 = arith.constant 0 : i32
    %c0_i32_1 = arith.constant 0 : i32
    return %c0_i32, %c0_i32_0 : i32, i32
  }
  func.func @transform_7(%arg0: i32) -> (i32, i32) {
    %c0_i32 = arith.constant 0 : i32
    %c0_i32_0 = arith.constant 0 : i32
    return %arg0, %c0_i32 : i32, i32
  }
}

</mosaic_0001>

<bundles_post_ra>
// kernel: classifier_forward.1
= control target key start
LH: loop header
LB: loop body
LE: loop exit
PB: predicated region body
PF: predicated region fallthrough
CT: control target
= control target key end

     0   :  { %vm50_vm0 = vcmask 261120   ;;  %vm107_vm1 = vcmask 523264   ;;  %vm205_vm5 = vcmask 15360   ;;  %s357_s1 = inlined_call_operand.vmem [shape: bf16[32,64], index: 1, kind: input, shape index: {}]   ;;  %s358_s0 = inlined_call_operand.vmem [shape: f32[16,32], index: 0, kind: input, shape index: {}]   ;;  %s359_s2 = inlined_call_operand.vmem [shape: f32[1,64], index: 2, kind: input, shape index: {}]   ;;  %s360_s4 = inlined_call_operand.vmem [shape: f32[1,32], index: 4, kind: input, shape index: {}]   ;;  %s361_s3 = inlined_call_operand.vmem [shape: bf16[64,32], index: 3, kind: input, shape index: {}]   ;;  %s362_s6 = inlined_call_operand.vmem [shape: f32[1,2], index: 6, kind: input, shape index: {}]   ;;  %s363_s5 = inlined_call_operand.vmem [shape: bf16[32,128], index: 5, kind: input, shape index: {}]   ;;  %s364_s7 = inlined_call_operand.vmem [shape: f32[16,2], index: 7, kind: output, shape index: {}]  }
   0x1   :  { %v250_v0 = vld [vmem:[%s357_s1 + $0x8] sm:$0xff]  ;;  %v249_v1 = vld [vmem:[%s357_s1] sm:$0xff]  ;;  %v254_v5 = vld [vmem:[%s361_s3 + $0x18] sm:$0xff] }
   0x2   :  { %60 = vmatpush.bf16.msra.mxu0 %v250_v0  ;;  %v27_v2 = vld [vmem:[%s358_s0] sm:$0xff]  ;;  %v28_v3 = vld [vmem:[%s358_s0 + $0x8] sm:$0xff]  ;;  %115 = vmatpush.bf16.msra.mxu1 %v254_v5  ;;  %v253_v6 = vld [vmem:[%s361_s3 + $0x10] sm:$0xff] }
   0x3   :  { %v29_v4 = vpack.c.bf16 %v28_v3, %v27_v2  ;;  %v252_v7 = vld [vmem:[%s361_s3 + $0x8] sm:$0xff]  ;;  %v251_v8 = vld [vmem:[%s361_s3] sm:$0xff] }
   0x4   :  { %v257_v10 = vld [vmem:[%s359_s2] ss:$0 sm:$0xff]  ;;  %v256_v17 = vld [vmem:[%s363_s5 + $0x8] sm:$0xff] }
   0x5   :  { %153 = vmatpush.bf16.msra.mxu2 %v256_v17  ;;  %v255_v18 = vld [vmem:[%s363_s5] sm:$0xff] }
   0x6   :  { %61 = vmatpush.bf16.msra.mxu0 %v249_v1  ;;  %116 = vmatpush.bf16.msra.mxu1 %v253_v6  ;;  %v258_v20 = vld [vmem:[%s360_s4] ss:$0 sm:$0xff] }
   0x7   :  { %v259_v27 = vld [vmem:[%s362_s6] ss:$0 sm:$0xff] }
   0x9   :  { %220 = vmatmul.msk.bf16.vlgmr.msra.gmra.mxu0 %vm50_vm0, %v29_v4  ;;  %154 = vmatpush.bf16.msra.mxu2 %v255_v18 }
   0xa   :  { %117 = vmatpush.bf16.msra.mxu1 %v252_v7 }
   0xe   :  { %118 = vmatpush.bf16.msra.mxu1 %v251_v8 }
  0x86   :  { %v63_v9 = vpop.f32.mrf.mxu0 }
  0x87   :  { %v64_v11 = vadd.f32 %v257_v10, %v63_v9 }
  0x89   :  { %v68_v14 = vmax.f32 %v64_v11, 0.0 }
  0x8e   :  { %v65_v12 = vpop.f32.mrf.mxu0 }
  0x8f   :  { %v66_v13 = vadd.f32 %v257_v10, %v65_v12 }
  0x91   :  { %v69_v15 = vmax.f32 %v66_v13, 0.0 }
  0x93   :  { %v70_v16 = vpack.c.bf16 %v69_v15, %v68_v14 }
  0x95   :  { %237 = vmatmul.msk.bf16.vlgmr.msra.gmra.mxu1 %vm107_vm1, %v70_v16 }
 0x112   :  { %v120_v19 = vpop.f32.mrf.mxu1 }
 0x113   :  { %v121_v21 = vadd.f32 %v258_v20, %v120_v19 }
 0x115   :  { %v125_v24 = vmax.f32 %v121_v21, 0.0 }
 0x11a   :  { %v122_v22 = vpop.f32.mrf.mxu1 }
 0x11b   :  { %v123_v23 = vadd.f32 %v258_v20, %v122_v22 }
 0x11d   :  { %v126_v25 = vmax.f32 %v123_v23, 0.0 }
 0x11f   :  { %v127_v26 = vpack.c.bf16 %v126_v25, %v125_v24 }
 0x121   :  { %246 = vmatmul.msk.bf16.vlgmr.msra.gmra.mxu2 %vm50_vm0, %v127_v26 }
 0x1a4   :  { %v156_v28 = vpop.f32.mrf.mxu2 }
 0x1a5   :  { %v165_v29 = vadd.f32 %v259_v27, %v156_v28 }
 0x1a7   :  { %v247_v30 = vmul.f32 -1.442695, %v165_v29 }
 0x1a9   :  { %260 = vpow2.f32 %v247_v30 }
 0x1ac   :  { %v158_v31 = vpop.f32.mrf.mxu2 }
 0x1ad   :  { %v166_v32 = vadd.f32 %v259_v27, %v158_v31 }
 0x1af   :  { %v261_v33 = vpop.eup %260  ;;  %v248_v34 = vmul.f32 -1.442695, %v166_v32 }
 0x1b0   :  { %v173_v35 = vadd.f32 1.0, %v261_v33 }
 0x1b1   :  { %262 = vpow2.f32 %v248_v34 }
 0x1b2   :  { %264 = vrcp.f32 %v173_v35  ;;  %v186_v41 = vand.u32 2147483648, %v173_v35  ;;  %v184_v43 = vand.u32 2147483647, %v173_v35  ;;  %vm180_vm3 = vweird.f32 %v173_v35 }
 0x1b4   :  { %v187_v46 = vor.u32 1.1754944e-38, %v186_v41  ;;  %vm185_vm6 = vcmp.eq.f32.partialorder %v184_v43, 8.507059e+37 }
 0x1b7   :  { %v263_v36 = vpop.eup %262 }
 0x1b8   :  { %v265_v37 = vpop.eup %264  ;;  %v174_v38 = vadd.f32 1.0, %v263_v36 }
 0x1b9   :  { %v176_v39 = vmul.f32 %v265_v37, %v173_v35  ;;  %vm181_vm2 = vweird.f32 %v265_v37 }
 0x1ba   :  { %266 = vrcp.f32 %v174_v38  ;;  %vm182_vm4 = vmor %vm180_vm3, %vm181_vm2  ;;  %v201_v51 = vand.u32 2147483648, %v174_v38  ;;  %v199_v53 = vand.u32 2147483647, %v174_v38  ;;  %vm195_vm8 = vweird.f32 %v174_v38 }
 0x1bb   :  { %v177_v40 = vsub.f32 1.0, %v176_v39 }
 0x1bc   :  { %v202_v55 = vor.u32 1.1754944e-38, %v201_v51  ;;  %vm200_vm10 = vcmp.eq.f32.partialorder %v199_v53, 8.507059e+37 }
 0x1bd   :  { %v178_v42 = vmul.f32 %v265_v37, %v177_v40 }
 0x1bf   :  { %v179_v44 = vadd.f32 %v265_v37, %v178_v42 }
 0x1c0   :  { %v267_v45 = vpop.eup %266 }
 0x1c1   :  { %v183_v47 = vsel %vm182_vm4, %v265_v37, %v179_v44  ;;  %v191_v48 = vmul.f32 %v267_v45, %v174_v38  ;;  %vm196_vm7 = vweird.f32 %v267_v45 }
 0x1c2   :  { %v188_v49 = vsel %vm185_vm6, %v187_v46, %v183_v47  ;;  %vm197_vm9 = vmor %vm195_vm8, %vm196_vm7 }
 0x1c3   :  { %206 = vst.msk [vmem:[%s364_s7] sm:$0xff] %vm205_vm5, %v188_v49  ;;  %v192_v50 = vsub.f32 1.0, %v191_v48 }
 0x1c5   :  { %v193_v52 = vmul.f32 %v267_v45, %v192_v50 }
 0x1c7   :  { %v194_v54 = vadd.f32 %v267_v45, %v193_v52 }
 0x1c9   :  { %v198_v56 = vsel %vm197_vm9, %v267_v45, %v194_v54 }
 0x1ca   :  { %v203_v57 = vsel %vm200_vm10, %v202_v55, %v198_v56 }
 0x1cb   :  { %207 = vst.msk [vmem:[%s364_s7 + $0x8] sm:$0xff] %vm205_vm5, %v203_v57 }

</bundles_post_ra>
